<compile_context>
chip_gen: v7x
topology: tpu7x:2x2x1
jax: 0.10.0
libtpu: 0.0.40
codegen_flags: <defaults>
</compile_context>

<pallas_src>
import jax
import jax.numpy as jnp
from jax.experimental import pallas as pl
from jax.experimental.pallas import tpu as pltpu


def _round_up(x: int, m: int) -> int:
    return ((x + m - 1) // m) * m


def _round_down(x: int, m: int) -> int:
    return (x // m) * m


def _vmem_budget_bytes() -> int:
    """~85% of the per-TensorCore VMEM capacity, with a safe generic fallback."""
    try:
        cap = int(pltpu.get_tpu_info().vmem_capacity_bytes)
        if cap > 0:
            return int(cap * 0.85)
    except Exception:
        pass
    return 48 * 1024 * 1024  # safe on v5e/v6e (128 MiB) and v7x (64 MiB/TC)


# ----------------------------------------------------------------------------- kernels


def _ffn_kernel(x_ref, w1_ref, b1_ref, w2_ref, b2_ref, o_ref):
    # x_ref: (TM, Hp) f32; w1_ref: (Hp, Kp) bf16; b1_ref: (1, Kp) f32;
    # w2_ref: (Kp, Hp) bf16; b2_ref: (1, Hp) f32.
    x = x_ref[...].astype(jnp.bfloat16)
    # MXU matmul #1 (bf16 in, f32 acc); bias + ReLU in f32 on the VPU.
    h = jnp.dot(x, w1_ref[...], preferred_element_type=jnp.float32) + b1_ref[...]
    h = jnp.maximum(h, 0.0).astype(jnp.bfloat16)
    # MXU matmul #2 (bf16 in, f32 acc); bias in f32, cast only at the store.
    y = jnp.dot(h, w2_ref[...], preferred_element_type=jnp.float32) + b2_ref[...]
    o_ref[...] = y.astype(o_ref.dtype)


def _ffn_kernel_kchunk(x_ref, w1_ref, b1_ref, w2_ref, b2_ref, o_ref, acc_ref):
    # Streams the hidden (2H) dimension in chunks of TK; exact because ReLU is
    # elementwise per hidden unit and the second matmul is a sum over hidden units.
    k = pl.program_id(1)

    @pl.when(k == 0)
    def _():
        acc_ref[...] = jnp.zeros_like(acc_ref)

    x = x_ref[...].astype(jnp.bfloat16)
    h = jnp.dot(x, w1_ref[...], preferred_element_type=jnp.float32) + b1_ref[...]
    h = jnp.maximum(h, 0.0).astype(jnp.bfloat16)
    acc_ref[...] += jnp.dot(h, w2_ref[...], preferred_element_type=jnp.float32)

    @pl.when(k == pl.num_programs(1) - 1)
    def _():
        o_ref[...] = (acc_ref[...] + b2_ref[...]).astype(o_ref.dtype)


# ----------------------------------------------------------------------------- wrapper


def position_wise_feed_forward(x, w1, b1, w2, b2, *, out_dtype=None, tm=None, tk=None):
    """x: (B, L, H).  w1: (H, 2H), b1: (2H,), w2: (2H, H), b2: (H,)."""
    B, L, H = x.shape
    K = w1.shape[1]  # 2H
    M = B * L
    out_dtype = x.dtype if out_dtype is None else out_dtype

    x_bytes = jnp.dtype(x.dtype).itemsize
    out_bytes = jnp.dtype(out_dtype).itemsize

    # Lane-dense feature dims (multiples of 128); zero padding is exact for this MLP
    # (padded x cols are 0; padded hidden units get bias 0 -> ReLU(0)=0 -> zero W2 rows).
    Hp = _round_up(H, 128)
    Kp = _round_up(K, 128)

    budget = _vmem_budget_bytes()
    headroom = max(4 * 1024 * 1024, budget // 8)  # Mosaic internal scratch, pipeline slack

    # ---- choose whether to stream the 2H dimension in chunks (large H / small VMEM) ----
    if tk is None:
        full_weight_bytes = 4 * Hp * Kp + (Kp + Hp) * 4  # both bf16 matrices + f32 biases
        TK = min(512, Kp) if full_weight_bytes > budget // 2 else Kp
    else:
        TK = min(_round_up(tk, 128), Kp)
    Kp = _round_up(Kp, TK)                 # make the chunk count exact
    use_chunks = TK < Kp

    if use_chunks:
        # per-chunk bf16 weights, default double-buffered (their index_map changes with k)
        resident = 2 * (2 * Hp * TK * 2) + 2 * (TK + Hp) * 4
        per_row = (2 * Hp * x_bytes        # x tile, double-buffered
                   + 2 * Hp * out_bytes    # out tile, double-buffered
                   + Hp * 4                # f32 accumulator scratch
                   + TK * 6 + Hp * 4)      # f32+bf16 h chunk, f32 partial
    else:
        # full bf16 weights, single-buffered (constant index_map)
        resident = 2 * Hp * Kp * 2 + (Kp + Hp) * 4
        per_row = (2 * Hp * x_bytes + 2 * Hp * out_bytes + Kp * 6 + Hp * 4)

    # ---- adaptive token tile TM from the VMEM budget ----
    avail = max(budget - headroom - resident, per_row * 8)
    tm_budget = max(avail // per_row, 8)
    if tm is not None:
        tm_budget = min(tm_budget, tm)
    tm_budget = min(tm_budget, 4096)
    TM = _round_down(tm_budget, 256) if tm_budget >= 256 else _round_down(tm_budget, 8)
    TM = max(TM, 8)
    TM = min(TM, _round_up(M, 8))          # don't over-pad tiny inputs
    Mp = _round_up(M, TM)

    # ---- operand prep: pad only when actually misaligned; weights pre-cast to bf16 ----
    x2d = x.reshape(M, H)
    if Mp != M or Hp != H:
        x2d = jnp.pad(x2d, ((0, Mp - M), (0, Hp - H)))
    w1p = (w1 if (Hp == H and Kp == K) else jnp.pad(w1, ((0, Hp - H), (0, Kp - K))))
    w1p = w1p.astype(jnp.bfloat16)
    w2p = (w2 if (Hp == H and Kp == K) else jnp.pad(w2, ((0, Kp - K), (0, Hp - H))))
    w2p = w2p.astype(jnp.bfloat16)
    b1p = (b1 if Kp == K else jnp.pad(b1, (0, Kp - K))).reshape(1, Kp)
    b2p = (b2 if Hp == H else jnp.pad(b2, (0, Hp - H))).reshape(1, Hp)

    cost = pl.CostEstimate(
        flops=4 * Mp * Hp * Kp,                          # two matmuls on padded shapes
        transcendentals=0,
        bytes_accessed=Mp * Hp * (x_bytes + out_bytes) + 4 * Hp * Kp + (Kp + Hp) * 4,
    )

    def _call(single_buffer_weights: bool, vmem_limit: int):
        weight_mode = pl.Buffered(1) if single_buffer_weights else None

        def wspec(shape, imap):
            if weight_mode is None:
                return pl.BlockSpec(shape, imap)
            return pl.BlockSpec(shape, imap, pipeline_mode=weight_mode)

        if not use_chunks:
            grid = (Mp // TM,)
            in_specs = [
                pl.BlockSpec((TM, Hp), lambda i: (i, 0)),   # activation tile (pipelined)
                wspec((Hp, Kp), lambda i: (0, 0)),          # W1 resident (bf16)
                wspec((1, Kp), lambda i: (0, 0)),           # b1 resident (f32)
                wspec((Kp, Hp), lambda i: (0, 0)),          # W2 resident (bf16)
                wspec((1, Hp), lambda i: (0, 0)),           # b2 resident (f32)
            ]
            out_specs = pl.BlockSpec((TM, Hp), lambda i: (i, 0))
            scratch = []
            kern = _ffn_kernel
            dims = ("parallel",)
        else:
            grid = (Mp // TM, Kp // TK)                     # reduction axis last
            in_specs = [
                pl.BlockSpec((TM, Hp), lambda i, k: (i, 0)),   # x tile (reused across k)
                pl.BlockSpec((Hp, TK), lambda i, k: (0, k)),   # W1 chunk (streamed)
                pl.BlockSpec((1, TK), lambda i, k: (0, k)),    # b1 chunk
                pl.BlockSpec((TK, Hp), lambda i, k: (k, 0)),   # W2 chunk (streamed)
                wspec((1, Hp), lambda i, k: (0, 0)),           # b2 resident
            ]
            out_specs = pl.BlockSpec((TM, Hp), lambda i, k: (i, 0))
            scratch = [pltpu.VMEM((TM, Hp), jnp.float32)]
            kern = _ffn_kernel_kchunk
            dims = ("parallel", "arbitrary")

        return pl.pallas_call(
            kern,
            out_shape=jax.ShapeDtypeStruct((Mp, Hp), out_dtype),
            grid_spec=pltpu.PrefetchScalarGridSpec(
                num_scalar_prefetch=0,
                grid=grid,
                in_specs=in_specs,
                out_specs=out_specs,
                scratch_shapes=scratch,
            ),
            compiler_params=pltpu.CompilerParams(
                dimension_semantics=dims,
                vmem_limit_bytes=int(vmem_limit),
            ),
            cost_estimate=cost,
        )(x2d, w1p, b1p, w2p, b2p)

    # Prefer single-buffered resident weights + generation-aware VMEM limit; fall back
    # gracefully so the kernel always compiles and runs.
    attempts = [(True, budget), (False, budget), (False, 64 * 1024 * 1024)]
    out2d = None
    last_err = None
    for single_buf, limit in attempts:
        try:
            out2d = _call(single_buf, limit)
            break
        except Exception as e:  # pragma: no cover - robustness across jax/TPU versions
            last_err = e
    if out2d is None:
        raise last_err

    if Mp != M or Hp != H:
        out2d = out2d[:M, :H]
    return out2d.reshape(B, L, H)


# ----------------------------------------------------------------------------- references


def _reference_f32(x, w1, b1, w2, b2):
    h = jnp.maximum(jnp.einsum("blh,hk->blk", x, w1) + b1, 0.0)
    return jnp.einsum("blk,kh->blh", h, w2) + b2


def _reference_bf16(x, w1, b1, w2, b2):
    # Same precision policy as the kernel: bf16 MXU inputs, f32 accumulation.
    xb, w1b, w2b = (a.astype(jnp.bfloat16) for a in (x, w1, w2))
    h = jnp.einsum("blh,hk->blk", xb, w1b, preferred_element_type=jnp.float32) + b1
    h = jnp.maximum(h, 0.0).astype(jnp.bfloat16)
    return jnp.einsum("blk,kh->blh", h, w2b, preferred_element_type=jnp.float32) + b2


if __name__ == "__main__":
    B, L, H = 2, 8, 32  # batch, sequence length, hidden_size

    key = jax.random.PRNGKey(0)
    keys = jax.random.split(key, 10)

    # Shapes match Conv1d(H, 2H, 1) and Conv1d(2H, H, 1) weights (kernel dim squeezed).
    x = jax.random.normal(keys[0], (B, L, H), dtype=jnp.float32)
    w1 = jax.random.normal(keys[1], (H, 2 * H), dtype=jnp.float32) * 0.05   # conv1.weight[:, :, 0].T
    b1 = jax.random.normal(keys[2], (2 * H,), dtype=jnp.float32) * 0.05     # conv1.bias
    w2 = jax.random.normal(keys[3], (2 * H, H), dtype=jnp.float32) * 0.05   # conv2.weight[:, :, 0].T
    b2 = jax.random.normal(keys[4], (H,), dtype=jnp.float32) * 0.05         # conv2.bias

    out = jax.block_until_ready(position_wise_feed_forward(x, w1, b1, w2, b2))
    assert out.shape == (B, L, H)
    # Tight check vs. a reference with the same bf16-in / f32-accumulate policy.
    assert jnp.allclose(out, _reference_bf16(x, w1, b1, w2, b2), atol=1e-3, rtol=1e-3)
    # Looser check vs. pure-f32 PyTorch-equivalent math (bf16 input rounding).
    assert jnp.allclose(out, _reference_f32(x, w1, b1, w2, b2), atol=2e-2, rtol=2e-2)

    # Exercise the K-chunked (streamed-weight) accumulator path on an aligned shape.
    H2 = 128
    x2 = jax.random.normal(keys[5], (B, L, H2), dtype=jnp.float32)
    w1b_ = jax.random.normal(keys[6], (H2, 2 * H2), dtype=jnp.float32) * 0.05
    b1b_ = jax.random.normal(keys[7], (2 * H2,), dtype=jnp.float32) * 0.05
    w2b_ = jax.random.normal(keys[8], (2 * H2, H2), dtype=jnp.float32) * 0.05
    b2b_ = jax.random.normal(keys[9], (H2,), dtype=jnp.float32) * 0.05
    out2 = jax.block_until_ready(
        position_wise_feed_forward(x2, w1b_, b1b_, w2b_, b2b_, tk=128))
    assert out2.shape == (B, L, H2)
    assert jnp.allclose(out2, _reference_bf16(x2, w1b_, b1b_, w2b_, b2b_), atol=1e-3, rtol=1e-3)
    assert jnp.allclose(out2, _reference_f32(x2, w1b_, b1b_, w2b_, b2b_), atol=2e-2, rtol=2e-2)

    print("KERNEL_OK")
</pallas_src>

<mosaic_0001>
module attributes {stable_mosaic.version = 11 : i64} {
  func.func @_ffn_kernel(%arg0: i32, %arg1: memref<16x128xf32, #tpu.memory_space<vmem>>, %arg2: memref<128x128xbf16, #tpu.memory_space<vmem>>, %arg3: memref<1x128xf32, #tpu.memory_space<vmem>>, %arg4: memref<128x128xbf16, #tpu.memory_space<vmem>>, %arg5: memref<1x128xf32, #tpu.memory_space<vmem>>, %arg6: memref<16x128xf32, #tpu.memory_space<vmem>>) attributes {dimension_semantics = [#tpu.dimension_semantics<parallel>], iteration_bounds = array<i64: 1>, scalar_prefetch = 0 : i64, scratch_operands = 0 : i64, tpu.core_type = #tpu.core_type<tc>, window_params = [{transform_indices = @transform_0, window_bounds = array<i64: 16, 128>}, {pipeline_mode = #tpu.pipeline_mode<synchronous>, transform_indices = @transform_1, window_bounds = array<i64: 128, 128>}, {pipeline_mode = #tpu.pipeline_mode<synchronous>, transform_indices = @transform_2, window_bounds = array<i64: 1, 128>}, {pipeline_mode = #tpu.pipeline_mode<synchronous>, transform_indices = @transform_3, window_bounds = array<i64: 128, 128>}, {pipeline_mode = #tpu.pipeline_mode<synchronous>, transform_indices = @transform_4, window_bounds = array<i64: 1, 128>}, {transform_indices = @transform_5, window_bounds = array<i64: 16, 128>}]} {
    %c0 = arith.constant 0 : index
    %c0_0 = arith.constant 0 : index
    %0 = vector.load %arg1[%c0, %c0_0] : memref<16x128xf32, #tpu.memory_space<vmem>>, vector<16x128xf32>
    %1 = arith.truncf %0 : vector<16x128xf32> to vector<16x128xbf16>
    %c0_1 = arith.constant 0 : index
    %c0_2 = arith.constant 0 : index
    %2 = vector.load %arg2[%c0_1, %c0_2] : memref<128x128xbf16, #tpu.memory_space<vmem>>, vector<128x128xbf16>
    %cst = arith.constant dense<0.000000e+00> : vector<16x128xf32>
    %3 = tpu.matmul %1, %2, %cst {dimension_numbers = #tpu.dot_dimension_numbers<[1], [0], [0], [1], [0, 0, 1, 1], [], []>} : vector<16x128xbf16>, vector<128x128xbf16>, vector<16x128xf32> -> vector<16x128xf32>
    %c0_3 = arith.constant 0 : index
    %c0_4 = arith.constant 0 : index
    %4 = vector.load %arg3[%c0_3, %c0_4] : memref<1x128xf32, #tpu.memory_space<vmem>>, vector<1x128xf32>
    %5 = vector.broadcast %4 : vector<1x128xf32> to vector<16x128xf32>
    %6 = arith.addf %3, %5 : vector<16x128xf32>
    %cst_5 = arith.constant 0.000000e+00 : f32
    %7 = vector.broadcast %cst_5 : f32 to vector<16x128xf32>
    %8 = arith.maximumf %6, %7 : vector<16x128xf32>
    %9 = arith.truncf %8 : vector<16x128xf32> to vector<16x128xbf16>
    %c0_6 = arith.constant 0 : index
    %c0_7 = arith.constant 0 : index
    %10 = vector.load %arg4[%c0_6, %c0_7] : memref<128x128xbf16, #tpu.memory_space<vmem>>, vector<128x128xbf16>
    %cst_8 = arith.constant dense<0.000000e+00> : vector<16x128xf32>
    %11 = tpu.matmul %9, %10, %cst_8 {dimension_numbers = #tpu.dot_dimension_numbers<[1], [0], [0], [1], [0, 0, 1, 1], [], []>} : vector<16x128xbf16>, vector<128x128xbf16>, vector<16x128xf32> -> vector<16x128xf32>
    %c0_9 = arith.constant 0 : index
    %c0_10 = arith.constant 0 : index
    %12 = vector.load %arg5[%c0_9, %c0_10] : memref<1x128xf32, #tpu.memory_space<vmem>>, vector<1x128xf32>
    %13 = vector.broadcast %12 : vector<1x128xf32> to vector<16x128xf32>
    %14 = arith.addf %11, %13 : vector<16x128xf32>
    %c0_11 = arith.constant 0 : index
    %c0_12 = arith.constant 0 : index
    %15 = vector.load %arg6[%c0_11, %c0_12] : memref<16x128xf32, #tpu.memory_space<vmem>>, vector<16x128xf32>
    tpu.vector_store %arg6[%c0_11, %c0_12], %14 {strides = array<i32>} : memref<16x128xf32, #tpu.memory_space<vmem>>, vector<16x128xf32>,
    return
  }
  func.func @transform_0(%arg0: i32) -> (i32, i32) {
    %c0_i32 = arith.constant 0 : i32
    %c0_i32_0 = arith.constant 0 : i32
    return %arg0, %c0_i32 : i32, i32
  }
  func.func @transform_1(%arg0: i32) -> (i32, i32) {
    %c0_i32 = arith.constant 0 : i32
    %c0_i32_0 = arith.constant 0 : i32
    %c0_i32_1 = arith.constant 0 : i32
    return %c0_i32, %c0_i32_0 : i32, i32
  }
  func.func @transform_2(%arg0: i32) -> (i32, i32) {
    %c0_i32 = arith.constant 0 : i32
    %c0_i32_0 = arith.constant 0 : i32
    %c0_i32_1 = arith.constant 0 : i32
    return %c0_i32, %c0_i32_0 : i32, i32
  }
  func.func @transform_3(%arg0: i32) -> (i32, i32) {
    %c0_i32 = arith.constant 0 : i32
    %c0_i32_0 = arith.constant 0 : i32
    %c0_i32_1 = arith.constant 0 : i32
    return %c0_i32, %c0_i32_0 : i32, i32
  }
  func.func @transform_4(%arg0: i32) -> (i32, i32) {
    %c0_i32 = arith.constant 0 : i32
    %c0_i32_0 = arith.constant 0 : i32
    %c0_i32_1 = arith.constant 0 : i32
    return %c0_i32, %c0_i32_0 : i32, i32
  }
  func.func @transform_5(%arg0: i32) -> (i32, i32) {
    %c0_i32 = arith.constant 0 : i32
    %c0_i32_0 = arith.constant 0 : i32
    return %arg0, %c0_i32 : i32, i32
  }
}

module attributes {stable_mosaic.version = 11 : i64} {
  func.func @_ffn_kernel(%arg0: i32, %arg1: memref<16x128xf32, #tpu.memory_space<vmem>>, %arg2: memref<128x128xbf16, #tpu.memory_space<vmem>>, %arg3: memref<1x128xf32, #tpu.memory_space<vmem>>, %arg4: memref<128x128xbf16, #tpu.memory_space<vmem>>, %arg5: memref<1x128xf32, #tpu.memory_space<vmem>>, %arg6: memref<16x128xf32, #tpu.memory_space<vmem>>) attributes {dimension_semantics = [#tpu.dimension_semantics<parallel>], iteration_bounds = array<i64: 1>, scalar_prefetch = 0 : i64, scratch_operands = 0 : i64, tpu.core_type = #tpu.core_type<tc>, window_params = [{transform_indices = @transform_0, window_bounds = array<i64: 16, 128>}, {pipeline_mode = #tpu.pipeline_mode<synchronous>, transform_indices = @transform_1, window_bounds = array<i64: 128, 128>}, {pipeline_mode = #tpu.pipeline_mode<synchronous>, transform_indices = @transform_2, window_bounds = array<i64: 1, 128>}, {pipeline_mode = #tpu.pipeline_mode<synchronous>, transform_indices = @transform_3, window_bounds = array<i64: 128, 128>}, {pipeline_mode = #tpu.pipeline_mode<synchronous>, transform_indices = @transform_4, window_bounds = array<i64: 1, 128>}, {transform_indices = @transform_5, window_bounds = array<i64: 16, 128>}]} {
    %c0 = arith.constant 0 : index
    %c0_0 = arith.constant 0 : index
    %0 = vector.load %arg1[%c0, %c0_0] : memref<16x128xf32, #tpu.memory_space<vmem>>, vector<16x128xf32>
    %1 = arith.truncf %0 : vector<16x128xf32> to vector<16x128xbf16>
    %c0_1 = arith.constant 0 : index
    %c0_2 = arith.constant 0 : index
    %2 = vector.load %arg2[%c0_1, %c0_2] : memref<128x128xbf16, #tpu.memory_space<vmem>>, vector<128x128xbf16>
    %cst = arith.constant dense<0.000000e+00> : vector<16x128xf32>
    %3 = tpu.matmul %1, %2, %cst {dimension_numbers = #tpu.dot_dimension_numbers<[1], [0], [0], [1], [0, 0, 1, 1], [], []>} : vector<16x128xbf16>, vector<128x128xbf16>, vector<16x128xf32> -> vector<16x128xf32>
    %c0_3 = arith.constant 0 : index
    %c0_4 = arith.constant 0 : index
    %4 = vector.load %arg3[%c0_3, %c0_4] : memref<1x128xf32, #tpu.memory_space<vmem>>, vector<1x128xf32>
    %5 = vector.broadcast %4 : vector<1x128xf32> to vector<16x128xf32>
    %6 = arith.addf %3, %5 : vector<16x128xf32>
    %cst_5 = arith.constant 0.000000e+00 : f32
    %7 = vector.broadcast %cst_5 : f32 to vector<16x128xf32>
    %8 = arith.maximumf %6, %7 : vector<16x128xf32>
    %9 = arith.truncf %8 : vector<16x128xf32> to vector<16x128xbf16>
    %c0_6 = arith.constant 0 : index
    %c0_7 = arith.constant 0 : index
    %10 = vector.load %arg4[%c0_6, %c0_7] : memref<128x128xbf16, #tpu.memory_space<vmem>>, vector<128x128xbf16>
    %cst_8 = arith.constant dense<0.000000e+00> : vector<16x128xf32>
    %11 = tpu.matmul %9, %10, %cst_8 {dimension_numbers = #tpu.dot_dimension_numbers<[1], [0], [0], [1], [0, 0, 1, 1], [], []>} : vector<16x128xbf16>, vector<128x128xbf16>, vector<16x128xf32> -> vector<16x128xf32>
    %c0_9 = arith.constant 0 : index
    %c0_10 = arith.constant 0 : index
    %12 = vector.load %arg5[%c0_9, %c0_10] : memref<1x128xf32, #tpu.memory_space<vmem>>, vector<1x128xf32>
    %13 = vector.broadcast %12 : vector<1x128xf32> to vector<16x128xf32>
    %14 = arith.addf %11, %13 : vector<16x128xf32>
    %c0_11 = arith.constant 0 : index
    %c0_12 = arith.constant 0 : index
    %15 = vector.load %arg6[%c0_11, %c0_12] : memref<16x128xf32, #tpu.memory_space<vmem>>, vector<16x128xf32>
    tpu.vector_store %arg6[%c0_11, %c0_12], %14 {strides = array<i32>} : memref<16x128xf32, #tpu.memory_space<vmem>>, vector<16x128xf32>,
    return
  }
  func.func @transform_0(%arg0: i32) -> (i32, i32) {
    %c0_i32 = arith.constant 0 : i32
    %c0_i32_0 = arith.constant 0 : i32
    return %arg0, %c0_i32 : i32, i32
  }
  func.func @transform_1(%arg0: i32) -> (i32, i32) {
    %c0_i32 = arith.constant 0 : i32
    %c0_i32_0 = arith.constant 0 : i32
    %c0_i32_1 = arith.constant 0 : i32
    return %c0_i32, %c0_i32_0 : i32, i32
  }
  func.func @transform_2(%arg0: i32) -> (i32, i32) {
    %c0_i32 = arith.constant 0 : i32
    %c0_i32_0 = arith.constant 0 : i32
    %c0_i32_1 = arith.constant 0 : i32
    return %c0_i32, %c0_i32_0 : i32, i32
  }
  func.func @transform_3(%arg0: i32) -> (i32, i32) {
    %c0_i32 = arith.constant 0 : i32
    %c0_i32_0 = arith.constant 0 : i32
    %c0_i32_1 = arith.constant 0 : i32
    return %c0_i32, %c0_i32_0 : i32, i32
  }
  func.func @transform_4(%arg0: i32) -> (i32, i32) {
    %c0_i32 = arith.constant 0 : i32
    %c0_i32_0 = arith.constant 0 : i32
    %c0_i32_1 = arith.constant 0 : i32
    return %c0_i32, %c0_i32_0 : i32, i32
  }
  func.func @transform_5(%arg0: i32) -> (i32, i32) {
    %c0_i32 = arith.constant 0 : i32
    %c0_i32_0 = arith.constant 0 : i32
    return %arg0, %c0_i32 : i32, i32
  }
}

module attributes {stable_mosaic.version = 11 : i64} {
  func.func @_ffn_kernel(%arg0: i32, %arg1: memref<16x128xf32, #tpu.memory_space<vmem>>, %arg2: memref<128x128xbf16, #tpu.memory_space<vmem>>, %arg3: memref<1x128xf32, #tpu.memory_space<vmem>>, %arg4: memref<128x128xbf16, #tpu.memory_space<vmem>>, %arg5: memref<1x128xf32, #tpu.memory_space<vmem>>, %arg6: memref<16x128xf32, #tpu.memory_space<vmem>>) attributes {dimension_semantics = [#tpu.dimension_semantics<parallel>], iteration_bounds = array<i64: 1>, scalar_prefetch = 0 : i64, scratch_operands = 0 : i64, tpu.core_type = #tpu.core_type<tc>, window_params = [{transform_indices = @transform_0, window_bounds = array<i64: 16, 128>}, {pipeline_mode = #tpu.pipeline_mode<synchronous>, transform_indices = @transform_1, window_bounds = array<i64: 128, 128>}, {pipeline_mode = #tpu.pipeline_mode<synchronous>, transform_indices = @transform_2, window_bounds = array<i64: 1, 128>}, {pipeline_mode = #tpu.pipeline_mode<synchronous>, transform_indices = @transform_3, window_bounds = array<i64: 128, 128>}, {pipeline_mode = #tpu.pipeline_mode<synchronous>, transform_indices = @transform_4, window_bounds = array<i64: 1, 128>}, {transform_indices = @transform_5, window_bounds = array<i64: 16, 128>}]} {
    %c0 = arith.constant 0 : index
    %c0_0 = arith.constant 0 : index
    %0 = vector.load %arg1[%c0, %c0_0] : memref<16x128xf32, #tpu.memory_space<vmem>>, vector<16x128xf32>
    %1 = arith.truncf %0 : vector<16x128xf32> to vector<16x128xbf16>
    %c0_1 = arith.constant 0 : index
    %c0_2 = arith.constant 0 : index
    %2 = vector.load %arg2[%c0_1, %c0_2] : memref<128x128xbf16, #tpu.memory_space<vmem>>, vector<128x128xbf16>
    %cst = arith.constant dense<0.000000e+00> : vector<16x128xf32>
    %3 = tpu.matmul %1, %2, %cst {dimension_numbers = #tpu.dot_dimension_numbers<[1], [0], [0], [1], [0, 0, 1, 1], [], []>} : vector<16x128xbf16>, vector<128x128xbf16>, vector<16x128xf32> -> vector<16x128xf32>
    %c0_3 = arith.constant 0 : index
    %c0_4 = arith.constant 0 : index
    %4 = vector.load %arg3[%c0_3, %c0_4] : memref<1x128xf32, #tpu.memory_space<vmem>>, vector<1x128xf32>
    %5 = vector.broadcast %4 : vector<1x128xf32> to vector<16x128xf32>
    %6 = arith.addf %3, %5 : vector<16x128xf32>
    %cst_5 = arith.constant 0.000000e+00 : f32
    %7 = vector.broadcast %cst_5 : f32 to vector<16x128xf32>
    %8 = arith.maximumf %6, %7 : vector<16x128xf32>
    %9 = arith.truncf %8 : vector<16x128xf32> to vector<16x128xbf16>
    %c0_6 = arith.constant 0 : index
    %c0_7 = arith.constant 0 : index
    %10 = vector.load %arg4[%c0_6, %c0_7] : memref<128x128xbf16, #tpu.memory_space<vmem>>, vector<128x128xbf16>
    %cst_8 = arith.constant dense<0.000000e+00> : vector<16x128xf32>
    %11 = tpu.matmul %9, %10, %cst_8 {dimension_numbers = #tpu.dot_dimension_numbers<[1], [0], [0], [1], [0, 0, 1, 1], [], []>} : vector<16x128xbf16>, vector<128x128xbf16>, vector<16x128xf32> -> vector<16x128xf32>
    %c0_9 = arith.constant 0 : index
    %c0_10 = arith.constant 0 : index
    %12 = vector.load %arg5[%c0_9, %c0_10] : memref<1x128xf32, #tpu.memory_space<vmem>>, vector<1x128xf32>
    %13 = vector.broadcast %12 : vector<1x128xf32> to vector<16x128xf32>
    %14 = arith.addf %11, %13 : vector<16x128xf32>
    %c0_11 = arith.constant 0 : index
    %c0_12 = arith.constant 0 : index
    %15 = vector.load %arg6[%c0_11, %c0_12] : memref<16x128xf32, #tpu.memory_space<vmem>>, vector<16x128xf32>
    tpu.vector_store %arg6[%c0_11, %c0_12], %14 {strides = array<i32>} : memref<16x128xf32, #tpu.memory_space<vmem>>, vector<16x128xf32>,
    return
  }
  func.func @transform_0(%arg0: i32) -> (i32, i32) {
    %c0_i32 = arith.constant 0 : i32
    %c0_i32_0 = arith.constant 0 : i32
    return %arg0, %c0_i32 : i32, i32
  }
  func.func @transform_1(%arg0: i32) -> (i32, i32) {
    %c0_i32 = arith.constant 0 : i32
    %c0_i32_0 = arith.constant 0 : i32
    %c0_i32_1 = arith.constant 0 : i32
    return %c0_i32, %c0_i32_0 : i32, i32
  }
  func.func @transform_2(%arg0: i32) -> (i32, i32) {
    %c0_i32 = arith.constant 0 : i32
    %c0_i32_0 = arith.constant 0 : i32
    %c0_i32_1 = arith.constant 0 : i32
    return %c0_i32, %c0_i32_0 : i32, i32
  }
  func.func @transform_3(%arg0: i32) -> (i32, i32) {
    %c0_i32 = arith.constant 0 : i32
    %c0_i32_0 = arith.constant 0 : i32
    %c0_i32_1 = arith.constant 0 : i32
    return %c0_i32, %c0_i32_0 : i32, i32
  }
  func.func @transform_4(%arg0: i32) -> (i32, i32) {
    %c0_i32 = arith.constant 0 : i32
    %c0_i32_0 = arith.constant 0 : i32
    %c0_i32_1 = arith.constant 0 : i32
    return %c0_i32, %c0_i32_0 : i32, i32
  }
  func.func @transform_5(%arg0: i32) -> (i32, i32) {
    %c0_i32 = arith.constant 0 : i32
    %c0_i32_0 = arith.constant 0 : i32
    return %arg0, %c0_i32 : i32, i32
  }
}

</mosaic_0001>

<bundles_post_ra>
// kernel: tpu_custom_call.1
= control target key start
LH: loop header
LB: loop body
LE: loop exit
PB: predicated region body
PF: predicated region fallthrough
CT: control target
= control target key end

     0   :  { %10 = vsyncpa [#allocation3], 0  ;;  %s615_s0 = inlined_call_operand.hbm [shape: f32[16,128], index: 0, kind: input, shape index: {}]   ;;  %s616_s1 = inlined_call_operand.hbm [shape: bf16[128,128], index: 1, kind: input, shape index: {}]   ;;  %s617_s2 = inlined_call_operand.vmem [shape: f32[1,128], index: 2, kind: input, shape index: {}]   ;;  %s618_s3 = inlined_call_operand.hbm [shape: bf16[128,128], index: 3, kind: input, shape index: {}]   ;;  %s619_s4 = inlined_call_operand.vmem [shape: f32[1,128], index: 4, kind: input, shape index: {}]   ;;  %s620_s5 = inlined_call_operand.hbm [shape: f32[16,128], index: 5, kind: output, shape index: {}]  }
   0x1   :  { %11 = vsyncpa [#allocation6], 0 }
   0x2   :  { %12 = vsyncpa [#allocation4], 0  ;;  %s509_s18 = smov [#allocation5]   ;;  %s415_s22 = scalar_lea.hbm %s616_s1, 1024 }
   0x3   :  { %s30_s19 = sshll.u32 %s509_s18, 4  ;;  %p416_p0 = scmp.ne.s32.totalorder %s616_s1, %s415_s22  ;;  %s31_s19 = int_to_ptr.vmem [resolvable:$true] %s30_s19 }
   0x4   :  { %p419_p1 = scmp.lt.u32.totalorder %s415_s22, %s616_s1 }
   0x6   :  { %p421_p2 = pnand %p419_p1, %p416_p0 }
   0x8   :  { %424 = shalt.err (!%p421_p2)
}
   0x9   :  { %s425_s27 = scalar_lea.vmem %s31_s19, 1024  ;;  %p430_p4 = scmp.lt.s32.totalorder %s31_s19, %s31_s19 }
   0xa   :  { %p426_p3 = scmp.ne.s32.totalorder %s31_s19, %s425_s27  ;;  %p431_p5 = scmp.lt.s32.totalorder %s425_s27, %s425_s27 }
   0xc   :  { %p432_p6 = por %p431_p5, %p430_p4 }
   0xe   :  { %p433_p7 = pnand %p432_p6, %p426_p3 }
  0x10   :  { %436 = shalt.err (!%p433_p7)
}
  0x11   :  { %s510_s28 = smov 64   ;;  %s511_s29 = smov 4  }
  0x12   :  { %36 = dma.hbm_to_vmem [thread:$0]  %s616_s1, 1024, %s31_s19, [#allocation6], %s510_s28, %s510_s28, %s511_s29  }
  0x13   :  { %s512_s7 = smov [#allocation2]   ;;  %s437_s11 = scalar_lea.hbm %s615_s0, 256 }
  0x14   :  { %s18_s8 = sshll.u32 %s512_s7, 4  ;;  %p438_p8 = scmp.ne.s32.totalorder %s615_s0, %s437_s11  ;;  %s19_s8 = int_to_ptr.vmem [resolvable:$true] %s18_s8 }
  0x15   :  { %p441_p9 = scmp.lt.u32.totalorder %s437_s11, %s615_s0 }
  0x17   :  { %p443_p10 = pnand %p441_p9, %p438_p8 }
  0x19   :  { %446 = shalt.err (!%p443_p10)
}
  0x1a   :  { %s447_s16 = scalar_lea.vmem %s19_s8, 256  ;;  %p452_p12 = scmp.lt.s32.totalorder %s19_s8, %s19_s8 }
  0x1b   :  { %p448_p11 = scmp.ne.s32.totalorder %s19_s8, %s447_s16  ;;  %p453_p13 = scmp.lt.s32.totalorder %s447_s16, %s447_s16 }
  0x1d   :  { %p454_p0 = por %p453_p13, %p452_p12 }
  0x1f   :  { %p455_p1 = pnand %p454_p0, %p448_p11 }
  0x21   :  { %458 = shalt.err (!%p455_p1)
}
  0x22   :  { %s513_s1 = smov 128   ;;  %s514_s17 = smov 8  }
  0x23   :  { %24 = dma.hbm_to_vmem [thread:$0]  %s615_s0, 256, %s19_s8, [#allocation3], %s513_s1, %s513_s1, %s514_s17  }
  0x24   :  { %s515_s20 = smov [#allocation7]   ;;  %s459_s24 = scalar_lea.hbm %s618_s3, 1024 }
  0x25   :  { %s44_s21 = sshll.u32 %s515_s20, 4  ;;  %p460_p2 = scmp.ne.s32.totalorder %s618_s3, %s459_s24  ;;  %s45_s21 = int_to_ptr.vmem [resolvable:$true] %s44_s21 }
  0x26   :  { %p463_p3 = scmp.lt.u32.totalorder %s459_s24, %s618_s3 }
  0x28   :  { %p465_p4 = pnand %p463_p3, %p460_p2 }
  0x2a   :  { %468 = shalt.err (!%p465_p4)
}
  0x2b   :  { %s469_s6 = scalar_lea.vmem %s45_s21, 1024  ;;  %p474_p6 = scmp.lt.s32.totalorder %s45_s21, %s45_s21 }
  0x2c   :  { %p470_p5 = scmp.ne.s32.totalorder %s45_s21, %s469_s6  ;;  %p475_p7 = scmp.lt.s32.totalorder %s469_s6, %s469_s6 }
  0x2e   :  { %p476_p8 = por %p475_p7, %p474_p6 }
  0x30   :  { %p477_p9 = pnand %p476_p8, %p470_p5 }
  0x32   :  { %480 = shalt.err (!%p477_p9)
}
  0x33   :  { %50 = dma.hbm_to_vmem [thread:$0]  %s618_s3, 1024, %s45_s21, [#allocation6], %s510_s28, %s510_s28, %s511_s29  }
  0x34   :  { %503 = dma.done.wait [#allocation3], 256  }
  0x35   :  { %504 = vsyncadd [#allocation3], 4294967040 }
  0x36   :  { %505 = dma.done.wait [#allocation6], 2048  }
  0x37   :  { %506 = vsyncadd [#allocation6], 4294965248  ;;  %v516_v0 = vmov 0.0   ;;  %vm517_vm0 = vmmov 0   ;;  %v399_v1 = vld [vmem:[#allocation5] sm:$0xff]   ;;  %v400_v2 = vld [vmem:[#allocation5 + $0x8] sm:$0xff]  }
  0x38   :  { %349 = vmatprep.subr.bf16.mxu0 %v516_v0  ;;  %365 = vmatprep.mubr.msk.bf16.mxu0 %vm517_vm0, %v516_v0  ;;  %v401_v3 = vld [vmem:[#allocation5 + $0x10] sm:$0xff]   ;;  %v407_v4 = vld [vmem:[#allocation7] sm:$0xff]   ;;  %v402_v5 = vld [vmem:[#allocation5 + $0x18] sm:$0xff]   ;;  %s518_s9 = smov [#allocation8]  }
  0x39   :  { %369 = vmatprep.subr.bf16.mxu1 %v516_v0  ;;  %385 = vmatprep.mubr.msk.bf16.mxu1 %vm517_vm0, %v516_v0  ;;  %v408_v6 = vld [vmem:[#allocation7 + $0x8] sm:$0xff]   ;;  %v403_v7 = vld [vmem:[#allocation5 + $0x20] sm:$0xff]   ;;  %v409_v8 = vld [vmem:[#allocation7 + $0x10] sm:$0xff]   ;;  %s300_s10 = sshll.u32 %s518_s9, 4  ;;  %s301_s10 = int_to_ptr.vmem [resolvable:$true] %s300_s10 }
  0x3a   :  { %350 = vmatpush3.bf16.msra.mxu0 %v399_v1  ;;  %370 = vmatpush3.bf16.msra.mxu1 %v407_v4  ;;  %v404_v9 = vld [vmem:[#allocation5 + $0x28] sm:$0xff]   ;;  %v410_v10 = vld [vmem:[#allocation7 + $0x18] sm:$0xff]   ;;  %v405_v11 = vld [vmem:[#allocation5 + $0x30] sm:$0xff]   ;;  %p486_p11 = scmp.lt.s32.totalorder %s301_s10, %s301_s10 }
  0x3b   :  { %351 = vmatprep.subr.bf16.mxu0 %v516_v0  ;;  %371 = vmatprep.subr.bf16.mxu1 %v516_v0  ;;  %v411_v12 = vld [vmem:[#allocation7 + $0x20] sm:$0xff]   ;;  %v406_v13 = vld [vmem:[#allocation5 + $0x38] sm:$0xff]   ;;  %v63_v14 = vld [vmem:[#allocation2] sm:$0xff] }
  0x3c   :  { %v64_v15 = vld [vmem:[#allocation2 + $0x8] sm:$0xff]  ;;  %v412_v16 = vld [vmem:[#allocation7 + $0x28] sm:$0xff]   ;;  %v413_v18 = vld [vmem:[#allocation7 + $0x30] sm:$0xff]  }
  0x3d   :  { %v65_v17 = vpack.c.bf16 %v64_v15, %v63_v14  ;;  %v414_v19 = vld [vmem:[#allocation7 + $0x38] sm:$0xff]   ;;  %v313_v20 = vld [vmem:[%s617_s2] ss:$0 sm:$0xff]  ;;  %s481_s2 = scalar_lea.vmem %s301_s10, 256 }
  0x3e   :  { %352 = vmatpush3.bf16.msra.mxu0 %v400_v2  ;;  %372 = vmatpush3.bf16.msra.mxu1 %v408_v6  ;;  %v322_v30 = vld [vmem:[%s619_s4] ss:$0 sm:$0xff]  ;;  %p482_p10 = scmp.ne.s32.totalorder %s301_s10, %s481_s2  ;;  %p487_p12 = scmp.lt.s32.totalorder %s481_s2, %s481_s2 }
  0x3f   :  { %353 = vmatprep.subr.bf16.mxu0 %v516_v0  ;;  %373 = vmatprep.subr.bf16.mxu1 %v516_v0 }
  0x40   :  { %p488_p13 = por %p487_p12, %p486_p11 }
  0x42   :  { %354 = vmatpush3.bf16.msra.mxu0 %v401_v3  ;;  %374 = vmatpush3.bf16.msra.mxu1 %v409_v8  ;;  %p489_p0 = pnand %p488_p13, %p482_p10 }
  0x43   :  { %355 = vmatprep.subr.bf16.mxu0 %v516_v0  ;;  %375 = vmatprep.subr.bf16.mxu1 %v516_v0 }
  0x46   :  { %356 = vmatpush3.bf16.msra.mxu0 %v402_v5  ;;  %376 = vmatpush3.bf16.msra.mxu1 %v410_v10 }
  0x47   :  { %357 = vmatprep.subr.bf16.mxu0 %v516_v0  ;;  %377 = vmatprep.subr.bf16.mxu1 %v516_v0 }
  0x4a   :  { %358 = vmatpush3.bf16.msra.mxu0 %v403_v7  ;;  %378 = vmatpush3.bf16.msra.mxu1 %v411_v12 }
  0x4b   :  { %359 = vmatprep.subr.bf16.mxu0 %v516_v0  ;;  %379 = vmatprep.subr.bf16.mxu1 %v516_v0 }
  0x4e   :  { %360 = vmatpush3.bf16.msra.mxu0 %v404_v9  ;;  %380 = vmatpush3.bf16.msra.mxu1 %v412_v16 }
  0x4f   :  { %361 = vmatprep.subr.bf16.mxu0 %v516_v0  ;;  %381 = vmatprep.subr.bf16.mxu1 %v516_v0 }
  0x52   :  { %362 = vmatpush3.bf16.msra.mxu0 %v405_v11  ;;  %382 = vmatpush3.bf16.msra.mxu1 %v413_v18 }
  0x53   :  { %363 = vmatprep.subr.bf16.mxu0 %v516_v0  ;;  %383 = vmatprep.subr.bf16.mxu1 %v516_v0 }
  0x56   :  { %364 = vmatpush3.bf16.msra.mxu0 %v406_v13  ;;  %384 = vmatpush3.bf16.msra.mxu1 %v414_v19 }
  0x59   :  { %366 = vmatmul.mubr.bf16.vlgmr.msra.gmra.mrb[0].mxu0 %v65_v17 }
 0x12c   :  { %v171_v21 = vpop.f32.mrb[0].mxu0 }
 0x12d   :  { %v172_v22 = vadd.f32 %v313_v20, %v171_v21  ;;  %v367_v23 = vpop.f32.mrb[1].mxu0 }
 0x12e   :  { %v174_v24 = vpop.f32.mrb[2].mxu0 }
 0x12f   :  { %v175_v25 = vadd.f32 %v313_v20, %v174_v24  ;;  %v368_v26 = vpop.f32.mrb[3].mxu0  ;;  %v178_v27 = vmax.f32 %v172_v22, 0.0 }
 0x131   :  { %v179_v28 = vmax.f32 %v175_v25, 0.0 }
 0x133   :  { %v180_v29 = vpack.c.bf16 %v179_v28, %v178_v27 }
 0x135   :  { %386 = vmatmul.mubr.bf16.vlgmr.msra.gmra.mrb[0].mxu1 %v180_v29 }
 0x208   :  { %v286_v31 = vpop.f32.mrb[0].mxu1 }
 0x209   :  { %v287_v32 = vadd.f32 %v322_v30, %v286_v31  ;;  %v387_v33 = vpop.f32.mrb[1].mxu1 }
 0x20a   :  { %v289_v34 = vpop.f32.mrb[2].mxu1 }
 0x20b   :  { %293 = vst [vmem:[#allocation8] sm:$0xff] %v287_v32  ;;  %v290_v35 = vadd.f32 %v322_v30, %v289_v34  ;;  %v388_v36 = vpop.f32.mrb[3].mxu1 }
 0x20d   :  { %294 = vst [vmem:[#allocation8 + $0x8] sm:$0xff] %v290_v35 }
 0x20e   :  { %492 = shalt.err (!%p489_p0)
}
 0x20f   :  { %s493_s12 = scalar_lea.hbm %s620_s5, 256 }
 0x210   :  { %p494_p1 = scmp.ne.s32.totalorder %s620_s5, %s493_s12  ;;  %p497_p2 = scmp.lt.u32.totalorder %s493_s12, %s620_s5 }
 0x212   :  { %p499_p3 = pnand %p497_p2, %p494_p1 }
 0x214   :  { %502 = shalt.err (!%p499_p3)
}
 0x215   :  { %306 = dma.vmem_to_hbm [thread:$0]  %s301_s10, 256, %s620_s5, [#allocation4], %s513_s1, %s513_s1, %s514_s17  }
 0x216   :  { %507 = dma.done.wait [#allocation4], 256  }
 0x217   :  { %508 = vsyncadd [#allocation4], 4294967040 }
 0x218   :  { %310 = vsyncpa [#allocation3], 1 }
 0x219   :  { %311 = vsyncpa [#allocation6], 1 }
 0x21a   :  { %312 = vsyncpa [#allocation4], 1 }

// kernel: tpu_custom_call.1
= control target key start
LH: loop header
LB: loop body
LE: loop exit
PB: predicated region body
PF: predicated region fallthrough
CT: control target
= control target key end

     0   :  { %10 = vsyncpa [#allocation3], 0  ;;  %s615_s0 = inlined_call_operand.hbm [shape: f32[16,128], index: 0, kind: input, shape index: {}]   ;;  %s616_s1 = inlined_call_operand.hbm [shape: bf16[128,128], index: 1, kind: input, shape index: {}]   ;;  %s617_s2 = inlined_call_operand.vmem [shape: f32[1,128], index: 2, kind: input, shape index: {}]   ;;  %s618_s3 = inlined_call_operand.hbm [shape: bf16[128,128], index: 3, kind: input, shape index: {}]   ;;  %s619_s4 = inlined_call_operand.vmem [shape: f32[1,128], index: 4, kind: input, shape index: {}]   ;;  %s620_s5 = inlined_call_operand.hbm [shape: f32[16,128], index: 5, kind: output, shape index: {}]  }
   0x1   :  { %11 = vsyncpa [#allocation6], 0 }
   0x2   :  { %12 = vsyncpa [#allocation4], 0  ;;  %s509_s18 = smov [#allocation5]   ;;  %s415_s22 = scalar_lea.hbm %s616_s1, 1024 }
   0x3   :  { %s30_s19 = sshll.u32 %s509_s18, 4  ;;  %p416_p0 = scmp.ne.s32.totalorder %s616_s1, %s415_s22  ;;  %s31_s19 = int_to_ptr.vmem [resolvable:$true] %s30_s19 }
   0x4   :  { %p419_p1 = scmp.lt.u32.totalorder %s415_s22, %s616_s1 }
   0x6   :  { %p421_p2 = pnand %p419_p1, %p416_p0 }
   0x8   :  { %424 = shalt.err (!%p421_p2)
}
   0x9   :  { %s425_s27 = scalar_lea.vmem %s31_s19, 1024  ;;  %p430_p4 = scmp.lt.s32.totalorder %s31_s19, %s31_s19 }
   0xa   :  { %p426_p3 = scmp.ne.s32.totalorder %s31_s19, %s425_s27  ;;  %p431_p5 = scmp.lt.s32.totalorder %s425_s27, %s425_s27 }
   0xc   :  { %p432_p6 = por %p431_p5, %p430_p4 }
   0xe   :  { %p433_p7 = pnand %p432_p6, %p426_p3 }
  0x10   :  { %436 = shalt.err (!%p433_p7)
}
  0x11   :  { %s510_s28 = smov 64   ;;  %s511_s29 = smov 4  }
  0x12   :  { %36 = dma.hbm_to_vmem [thread:$0]  %s616_s1, 1024, %s31_s19, [#allocation6], %s510_s28, %s510_s28, %s511_s29  }
  0x13   :  { %s512_s7 = smov [#allocation2]   ;;  %s437_s11 = scalar_lea.hbm %s615_s0, 256 }
  0x14   :  { %s18_s8 = sshll.u32 %s512_s7, 4  ;;  %p438_p8 = scmp.ne.s32.totalorder %s615_s0, %s437_s11  ;;  %s19_s8 = int_to_ptr.vmem [resolvable:$true] %s18_s8 }
  0x15   :  { %p441_p9 = scmp.lt.u32.totalorder %s437_s11, %s615_s0 }
  0x17   :  { %p443_p10 = pnand %p441_p9, %p438_p8 }
  0x19   :  { %446 = shalt.err (!%p443_p10)
}
  0x1a   :  { %s447_s16 = scalar_lea.vmem %s19_s8, 256  ;;  %p452_p12 = scmp.lt.s32.totalorder %s19_s8, %s19_s8 }
  0x1b   :  { %p448_p11 = scmp.ne.s32.totalorder %s19_s8, %s447_s16  ;;  %p453_p13 = scmp.lt.s32.totalorder %s447_s16, %s447_s16 }
  0x1d   :  { %p454_p0 = por %p453_p13, %p452_p12 }
  0x1f   :  { %p455_p1 = pnand %p454_p0, %p448_p11 }
  0x21   :  { %458 = shalt.err (!%p455_p1)
}
  0x22   :  { %s513_s1 = smov 128   ;;  %s514_s17 = smov 8  }
  0x23   :  { %24 = dma.hbm_to_vmem [thread:$0]  %s615_s0, 256, %s19_s8, [#allocation3], %s513_s1, %s513_s1, %s514_s17  }
  0x24   :  { %s515_s20 = smov [#allocation7]   ;;  %s459_s24 = scalar_lea.hbm %s618_s3, 1024 }
  0x25   :  { %s44_s21 = sshll.u32 %s515_s20, 4  ;;  %p460_p2 = scmp.ne.s32.totalorder %s618_s3, %s459_s24  ;;  %s45_s21 = int_to_ptr.vmem [resolvable:$true] %s44_s21 }
  0x26   :  { %p463_p3 = scmp.lt.u32.totalorder %s459_s24, %s618_s3 }
  0x28   :  { %p465_p4 = pnand %p463_p3, %p460_p2 }
  0x2a   :  { %468 = shalt.err (!%p465_p4)
}
  0x2b   :  { %s469_s6 = scalar_lea.vmem %s45_s21, 1024  ;;  %p474_p6 = scmp.lt.s32.totalorder %s45_s21, %s45_s21 }
  0x2c   :  { %p470_p5 = scmp.ne.s32.totalorder %s45_s21, %s469_s6  ;;  %p475_p7 = scmp.lt.s32.totalorder %s469_s6, %s469_s6 }
  0x2e   :  { %p476_p8 = por %p475_p7, %p474_p6 }
  0x30   :  { %p477_p9 = pnand %p476_p8, %p470_p5 }
  0x32   :  { %480 = shalt.err (!%p477_p9)
}
  0x33   :  { %50 = dma.hbm_to_vmem [thread:$0]  %s618_s3, 1024, %s45_s21, [#allocation6], %s510_s28, %s510_s28, %s511_s29  }
  0x34   :  { %503 = dma.done.wait [#allocation3], 256  }
  0x35   :  { %504 = vsyncadd [#allocation3], 4294967040 }
  0x36   :  { %505 = dma.done.wait [#allocation6], 2048  }
  0x37   :  { %506 = vsyncadd [#allocation6], 4294965248  ;;  %v516_v0 = vmov 0.0   ;;  %vm517_vm0 = vmmov 0   ;;  %v399_v1 = vld [vmem:[#allocation5] sm:$0xff]   ;;  %v400_v2 = vld [vmem:[#allocation5 + $0x8] sm:$0xff]  }
  0x38   :  { %349 = vmatprep.subr.bf16.mxu0 %v516_v0  ;;  %365 = vmatprep.mubr.msk.bf16.mxu0 %vm517_vm0, %v516_v0  ;;  %v401_v3 = vld [vmem:[#allocation5 + $0x10] sm:$0xff]   ;;  %v407_v4 = vld [vmem:[#allocation7] sm:$0xff]   ;;  %v402_v5 = vld [vmem:[#allocation5 + $0x18] sm:$0xff]   ;;  %s518_s9 = smov [#allocation8]  }
  0x39   :  { %369 = vmatprep.subr.bf16.mxu1 %v516_v0  ;;  %385 = vmatprep.mubr.msk.bf16.mxu1 %vm517_vm0, %v516_v0  ;;  %v408_v6 = vld [vmem:[#allocation7 + $0x8] sm:$0xff]   ;;  %v403_v7 = vld [vmem:[#allocation5 + $0x20] sm:$0xff]   ;;  %v409_v8 = vld [vmem:[#allocation7 + $0x10] sm:$0xff]   ;;  %s300_s10 = sshll.u32 %s518_s9, 4  ;;  %s301_s10 = int_to_ptr.vmem [resolvable:$true] %s300_s10 }
  0x3a   :  { %350 = vmatpush3.bf16.msra.mxu0 %v399_v1  ;;  %370 = vmatpush3.bf16.msra.mxu1 %v407_v4  ;;  %v404_v9 = vld [vmem:[#allocation5 + $0x28] sm:$0xff]   ;;  %v410_v10 = vld [vmem:[#allocation7 + $0x18] sm:$0xff]   ;;  %v405_v11 = vld [vmem:[#allocation5 + $0x30] sm:$0xff]   ;;  %p486_p11 = scmp.lt.s32.totalorder %s301_s10, %s301_s10 }
  0x3b   :  { %351 = vmatprep.subr.bf16.mxu0 %v516_v0  ;;  %371 = vmatprep.subr.bf16.mxu1 %v516_v0  ;;  %v411_v12 = vld [vmem:[#allocation7 + $0x20] sm:$0xff]   ;;  %v406_v13 = vld [vmem:[#allocation5 + $0x38] sm:$0xff]   ;;  %v63_v14 = vld [vmem:[#allocation2] sm:$0xff] }
  0x3c   :  { %v64_v15 = vld [vmem:[#allocation2 + $0x8] sm:$0xff]  ;;  %v412_v16 = vld [vmem:[#allocation7 + $0x28] sm:$0xff]   ;;  %v413_v18 = vld [vmem:[#allocation7 + $0x30] sm:$0xff]  }
  0x3d   :  { %v65_v17 = vpack.c.bf16 %v64_v15, %v63_v14  ;;  %v414_v19 = vld [vmem:[#allocation7 + $0x38] sm:$0xff]   ;;  %v313_v20 = vld [vmem:[%s617_s2] ss:$0 sm:$0xff]  ;;  %s481_s2 = scalar_lea.vmem %s301_s10, 256 }
  0x3e   :  { %352 = vmatpush3.bf16.msra.mxu0 %v400_v2  ;;  %372 = vmatpush3.bf16.msra.mxu1 %v408_v6  ;;  %v322_v30 = vld [vmem:[%s619_s4] ss:$0 sm:$0xff]  ;;  %p482_p10 = scmp.ne.s32.totalorder %s301_s10, %s481_s2  ;;  %p487_p12 = scmp.lt.s32.totalorder %s481_s2, %s481_s2 }
  0x3f   :  { %353 = vmatprep.subr.bf16.mxu0 %v516_v0  ;;  %373 = vmatprep.subr.bf16.mxu1 %v516_v0 }
  0x40   :  { %p488_p13 = por %p487_p12, %p486_p11 }
  0x42   :  { %354 = vmatpush3.bf16.msra.mxu0 %v401_v3  ;;  %374 = vmatpush3.bf16.msra.mxu1 %v409_v8  ;;  %p489_p0 = pnand %p488_p13, %p482_p10 }
  0x43   :  { %355 = vmatprep.subr.bf16.mxu0 %v516_v0  ;;  %375 = vmatprep.subr.bf16.mxu1 %v516_v0 }
  0x46   :  { %356 = vmatpush3.bf16.msra.mxu0 %v402_v5  ;;  %376 = vmatpush3.bf16.msra.mxu1 %v410_v10 }
  0x47   :  { %357 = vmatprep.subr.bf16.mxu0 %v516_v0  ;;  %377 = vmatprep.subr.bf16.mxu1 %v516_v0 }
  0x4a   :  { %358 = vmatpush3.bf16.msra.mxu0 %v403_v7  ;;  %378 = vmatpush3.bf16.msra.mxu1 %v411_v12 }
  0x4b   :  { %359 = vmatprep.subr.bf16.mxu0 %v516_v0  ;;  %379 = vmatprep.subr.bf16.mxu1 %v516_v0 }
  0x4e   :  { %360 = vmatpush3.bf16.msra.mxu0 %v404_v9  ;;  %380 = vmatpush3.bf16.msra.mxu1 %v412_v16 }
  0x4f   :  { %361 = vmatprep.subr.bf16.mxu0 %v516_v0  ;;  %381 = vmatprep.subr.bf16.mxu1 %v516_v0 }
  0x52   :  { %362 = vmatpush3.bf16.msra.mxu0 %v405_v11  ;;  %382 = vmatpush3.bf16.msra.mxu1 %v413_v18 }
  0x53   :  { %363 = vmatprep.subr.bf16.mxu0 %v516_v0  ;;  %383 = vmatprep.subr.bf16.mxu1 %v516_v0 }
  0x56   :  { %364 = vmatpush3.bf16.msra.mxu0 %v406_v13  ;;  %384 = vmatpush3.bf16.msra.mxu1 %v414_v19 }
  0x59   :  { %366 = vmatmul.mubr.bf16.vlgmr.msra.gmra.mrb[0].mxu0 %v65_v17 }
 0x12c   :  { %v171_v21 = vpop.f32.mrb[0].mxu0 }
 0x12d   :  { %v172_v22 = vadd.f32 %v313_v20, %v171_v21  ;;  %v367_v23 = vpop.f32.mrb[1].mxu0 }
 0x12e   :  { %v174_v24 = vpop.f32.mrb[2].mxu0 }
 0x12f   :  { %v175_v25 = vadd.f32 %v313_v20, %v174_v24  ;;  %v368_v26 = vpop.f32.mrb[3].mxu0  ;;  %v178_v27 = vmax.f32 %v172_v22, 0.0 }
 0x131   :  { %v179_v28 = vmax.f32 %v175_v25, 0.0 }
 0x133   :  { %v180_v29 = vpack.c.bf16 %v179_v28, %v178_v27 }
 0x135   :  { %386 = vmatmul.mubr.bf16.vlgmr.msra.gmra.mrb[0].mxu1 %v180_v29 }
 0x208   :  { %v286_v31 = vpop.f32.mrb[0].mxu1 }
 0x209   :  { %v287_v32 = vadd.f32 %v322_v30, %v286_v31  ;;  %v387_v33 = vpop.f32.mrb[1].mxu1 }
 0x20a   :  { %v289_v34 = vpop.f32.mrb[2].mxu1 }
 0x20b   :  { %293 = vst [vmem:[#allocation8] sm:$0xff] %v287_v32  ;;  %v290_v35 = vadd.f32 %v322_v30, %v289_v34  ;;  %v388_v36 = vpop.f32.mrb[3].mxu1 }
 0x20d   :  { %294 = vst [vmem:[#allocation8 + $0x8] sm:$0xff] %v290_v35 }
 0x20e   :  { %492 = shalt.err (!%p489_p0)
}
 0x20f   :  { %s493_s12 = scalar_lea.hbm %s620_s5, 256 }
 0x210   :  { %p494_p1 = scmp.ne.s32.totalorder %s620_s5, %s493_s12  ;;  %p497_p2 = scmp.lt.u32.totalorder %s493_s12, %s620_s5 }
 0x212   :  { %p499_p3 = pnand %p497_p2, %p494_p1 }
 0x214   :  { %502 = shalt.err (!%p499_p3)
}
 0x215   :  { %306 = dma.vmem_to_hbm [thread:$0]  %s301_s10, 256, %s620_s5, [#allocation4], %s513_s1, %s513_s1, %s514_s17  }
 0x216   :  { %507 = dma.done.wait [#allocation4], 256  }
 0x217   :  { %508 = vsyncadd [#allocation4], 4294967040 }
 0x218   :  { %310 = vsyncpa [#allocation3], 1 }
 0x219   :  { %311 = vsyncpa [#allocation6], 1 }
 0x21a   :  { %312 = vsyncpa [#allocation4], 1 }

// kernel: tpu_custom_call.1
= control target key start
LH: loop header
LB: loop body
LE: loop exit
PB: predicated region body
PF: predicated region fallthrough
CT: control target
= control target key end

     0   :  { %10 = vsyncpa [#allocation3], 0  ;;  %s701_s0 = inlined_call_operand.hbm [shape: f32[16,128], index: 0, kind: input, shape index: {}]   ;;  %s702_s1 = inlined_call_operand.hbm [shape: bf16[128,128], index: 1, kind: input, shape index: {}]   ;;  %s703_s2 = inlined_call_operand.hbm [shape: f32[1,128], index: 2, kind: input, shape index: {}]   ;;  %s704_s3 = inlined_call_operand.hbm [shape: bf16[128,128], index: 3, kind: input, shape index: {}]   ;;  %s705_s4 = inlined_call_operand.hbm [shape: f32[1,128], index: 4, kind: input, shape index: {}]   ;;  %s706_s5 = inlined_call_operand.hbm [shape: f32[16,128], index: 5, kind: output, shape index: {}]  }
   0x1   :  { %11 = vsyncpa [#allocation6], 0 }
   0x2   :  { %12 = vsyncpa [#allocation9], 0 }
   0x3   :  { %13 = vsyncpa [#allocation4], 0  ;;  %s581_s18 = smov [#allocation5]   ;;  %s441_s22 = scalar_lea.hbm %s702_s1, 1024 }
   0x4   :  { %s31_s19 = sshll.u32 %s581_s18, 4  ;;  %p442_p0 = scmp.ne.s32.totalorder %s702_s1, %s441_s22  ;;  %s32_s19 = int_to_ptr.vmem [resolvable:$true] %s31_s19 }
   0x5   :  { %p445_p1 = scmp.lt.u32.totalorder %s441_s22, %s702_s1 }
   0x7   :  { %p447_p2 = pnand %p445_p1, %p442_p0 }
   0x9   :  { %450 = shalt.err (!%p447_p2)
}
   0xa   :  { %s451_s27 = scalar_lea.vmem %s32_s19, 1024  ;;  %p456_p4 = scmp.lt.s32.totalorder %s32_s19, %s32_s19 }
   0xb   :  { %p452_p3 = scmp.ne.s32.totalorder %s32_s19, %s451_s27  ;;  %p457_p5 = scmp.lt.s32.totalorder %s451_s27, %s451_s27 }
   0xd   :  { %p458_p6 = por %p457_p5, %p456_p4 }
   0xf   :  { %p459_p7 = pnand %p458_p6, %p452_p3 }
  0x11   :  { %462 = shalt.err (!%p459_p7)
}
  0x12   :  { %s582_s28 = smov 64   ;;  %s583_s29 = smov 4  }
  0x13   :  { %37 = dma.hbm_to_vmem [thread:$0]  %s702_s1, 1024, %s32_s19, [#allocation6], %s582_s28, %s582_s28, %s583_s29  }
  0x14   :  { %s584_s7 = smov [#allocation8]   ;;  %s585_s9 = smov [#allocation2]  }
  0x15   :  { %s53_s8 = sshll.u32 %s584_s7, 4  ;;  %s19_s10 = sshll.u32 %s585_s9, 4  ;;  %s54_s8 = int_to_ptr.vmem [resolvable:$true] %s53_s8  ;;  %s20_s10 = int_to_ptr.vmem [resolvable:$true] %s19_s10 }
  0x16   :  { %s463_s13 = scalar_lea.hbm %s704_s3, 1024 }
  0x17   :  { %p464_p8 = scmp.ne.s32.totalorder %s704_s3, %s463_s13  ;;  %p467_p9 = scmp.lt.u32.totalorder %s463_s13, %s704_s3 }
  0x19   :  { %p469_p10 = pnand %p467_p9, %p464_p8 }
  0x1b   :  { %472 = shalt.err (!%p469_p10)
}
  0x1c   :  { %s473_s1 = scalar_lea.vmem %s54_s8, 1024  ;;  %p478_p12 = scmp.lt.s32.totalorder %s54_s8, %s54_s8 }
  0x1d   :  { %p474_p11 = scmp.ne.s32.totalorder %s54_s8, %s473_s1  ;;  %p479_p13 = scmp.lt.s32.totalorder %s473_s1, %s473_s1 }
  0x1f   :  { %p480_p0 = por %p479_p13, %p478_p12 }
  0x21   :  { %p481_p1 = pnand %p480_p0, %p474_p11 }
  0x23   :  { %484 = shalt.err (!%p481_p1)
}
  0x24   :  { %59 = dma.hbm_to_vmem [thread:$0]  %s704_s3, 1024, %s54_s8, [#allocation9], %s582_s28, %s582_s28, %s583_s29  }
  0x25   :  { %s485_s22 = scalar_lea.hbm %s701_s0, 256 }
  0x26   :  { %p486_p2 = scmp.ne.s32.totalorder %s701_s0, %s485_s22  ;;  %p489_p3 = scmp.lt.u32.totalorder %s485_s22, %s701_s0 }
  0x28   :  { %p491_p4 = pnand %p489_p3, %p486_p2 }
  0x2a   :  { %494 = shalt.err (!%p491_p4)
}
  0x2b   :  { %s495_s27 = scalar_lea.vmem %s20_s10, 256  ;;  %p500_p6 = scmp.lt.s32.totalorder %s20_s10, %s20_s10 }
  0x2c   :  { %p496_p5 = scmp.ne.s32.totalorder %s20_s10, %s495_s27  ;;  %p501_p7 = scmp.lt.s32.totalorder %s495_s27, %s495_s27 }
  0x2e   :  { %p502_p8 = por %p501_p7, %p500_p6 }
  0x30   :  { %p503_p9 = pnand %p502_p8, %p496_p5 }
  0x32   :  { %506 = shalt.err (!%p503_p9)
}
  0x33   :  { %s586_s3 = smov 128   ;;  %s587_s28 = smov 8  }
  0x34   :  { %25 = dma.hbm_to_vmem [thread:$0]  %s701_s0, 256, %s20_s10, [#allocation3], %s586_s3, %s586_s3, %s587_s28  }
  0x35   :  { %s588_s6 = smov [#allocation7]   ;;  %s589_s8 = smov [#allocation10]  }
  0x36   :  { %s44_s7 = sshll.u32 %s588_s6, 4  ;;  %s66_s9 = sshll.u32 %s589_s8, 4  ;;  %s45_s7 = int_to_ptr.vmem [resolvable:$true] %s44_s7  ;;  %s67_s9 = int_to_ptr.vmem [resolvable:$true] %s66_s9 }
  0x37   :  { %s507_s13 = scalar_lea.hbm %s703_s2, 16 }
  0x38   :  { %p508_p10 = scmp.ne.s32.totalorder %s703_s2, %s507_s13  ;;  %p511_p11 = scmp.lt.u32.totalorder %s507_s13, %s703_s2 }
  0x3a   :  { %p513_p12 = pnand %p511_p11, %p508_p10 }
  0x3c   :  { %516 = shalt.err (!%p513_p12)
}
  0x3d   :  { %s517_s0 = scalar_lea.vmem %s45_s7, 16  ;;  %s521_s10 = scalar_lea.vmem %s45_s7, 32 }
  0x3e   :  { %p518_p13 = scmp.ne.s32.totalorder %s45_s7, %s517_s0  ;;  %p522_p0 = scmp.lt.s32.totalorder %s45_s7, %s45_s7 }
  0x3f   :  { %p523_p1 = scmp.lt.s32.totalorder %s521_s10, %s517_s0 }
  0x41   :  { %p524_p2 = por %p523_p1, %p522_p0 }
  0x43   :  { %p525_p3 = pnand %p524_p2, %p518_p13 }
  0x45   :  { %528 = shalt.err (!%p525_p3)
}
  0x46   :  { %47 = dma.hbm_to_vmem [thread:$0]  %s703_s2, 16, %s45_s7, [#allocation6]  }
  0x47   :  { %s529_s21 = scalar_lea.hbm %s705_s4, 16 }
  0x48   :  { %p530_p4 = scmp.ne.s32.totalorder %s705_s4, %s529_s21  ;;  %p533_p5 = scmp.lt.u32.totalorder %s529_s21, %s705_s4 }
  0x4a   :  { %p535_p6 = pnand %p533_p5, %p530_p4 }
  0x4c   :  { %538 = shalt.err (!%p535_p6)
}
  0x4d   :  { %s539_s26 = scalar_lea.vmem %s67_s9, 16  ;;  %s543_s27 = scalar_lea.vmem %s67_s9, 32 }
  0x4e   :  { %p540_p7 = scmp.ne.s32.totalorder %s67_s9, %s539_s26  ;;  %p544_p8 = scmp.lt.s32.totalorder %s67_s9, %s67_s9 }
  0x4f   :  { %p545_p9 = scmp.lt.s32.totalorder %s543_s27, %s539_s26 }
  0x51   :  { %p546_p10 = por %p545_p9, %p544_p8 }
  0x53   :  { %p547_p11 = pnand %p546_p10, %p540_p7 }
  0x55   :  { %550 = shalt.err (!%p547_p11)
}
  0x56   :  { %69 = dma.hbm_to_vmem [thread:$0]  %s705_s4, 16, %s67_s9, [#allocation9]  }
  0x57   :  { %573 = dma.done.wait [#allocation3], 256  }
  0x58   :  { %574 = vsyncadd [#allocation3], 4294967040 }
  0x59   :  { %575 = dma.done.wait [#allocation6], 1040  }
  0x5a   :  { %576 = vsyncadd [#allocation6], 4294966256 }
  0x5b   :  { %577 = dma.done.wait [#allocation9], 1040  }
  0x5c   :  { %578 = vsyncadd [#allocation9], 4294966256  ;;  %v590_v0 = vmov 0.0   ;;  %vm591_vm0 = vmmov 0   ;;  %v425_v1 = vld [vmem:[#allocation5] sm:$0xff]   ;;  %v426_v2 = vld [vmem:[#allocation5 + $0x8] sm:$0xff]  }
  0x5d   :  { %373 = vmatprep.subr.bf16.mxu0 %v590_v0  ;;  %389 = vmatprep.mubr.msk.bf16.mxu0 %vm591_vm0, %v590_v0  ;;  %v427_v3 = vld [vmem:[#allocation5 + $0x10] sm:$0xff]   ;;  %v433_v4 = vld [vmem:[#allocation8] sm:$0xff]   ;;  %v428_v5 = vld [vmem:[#allocation5 + $0x18] sm:$0xff]   ;;  %s592_s4 = smov [#allocation11]  }
  0x5e   :  { %393 = vmatprep.subr.bf16.mxu1 %v590_v0  ;;  %409 = vmatprep.mubr.msk.bf16.mxu1 %vm591_vm0, %v590_v0  ;;  %v434_v6 = vld [vmem:[#allocation8 + $0x8] sm:$0xff]   ;;  %v429_v7 = vld [vmem:[#allocation5 + $0x20] sm:$0xff]   ;;  %v435_v8 = vld [vmem:[#allocation8 + $0x10] sm:$0xff]   ;;  %s323_s30 = sshll.u32 %s592_s4, 4  ;;  %s324_s30 = int_to_ptr.vmem [resolvable:$true] %s323_s30 }
  0x5f   :  { %374 = vmatpush3.bf16.msra.mxu0 %v425_v1  ;;  %394 = vmatpush3.bf16.msra.mxu1 %v433_v4  ;;  %v430_v9 = vld [vmem:[#allocation5 + $0x28] sm:$0xff]   ;;  %v436_v10 = vld [vmem:[#allocation8 + $0x18] sm:$0xff]   ;;  %v431_v11 = vld [vmem:[#allocation5 + $0x30] sm:$0xff]   ;;  %s551_s6 = scalar_lea.vmem %s324_s30, 256  ;;  %p556_p13 = scmp.lt.s32.totalorder %s324_s30, %s324_s30 }
  0x60   :  { %375 = vmatprep.subr.bf16.mxu0 %v590_v0  ;;  %395 = vmatprep.subr.bf16.mxu1 %v590_v0  ;;  %v437_v12 = vld [vmem:[#allocation8 + $0x20] sm:$0xff]   ;;  %v432_v13 = vld [vmem:[#allocation5 + $0x38] sm:$0xff]   ;;  %v86_v14 = vld [vmem:[#allocation2] sm:$0xff]  ;;  %p552_p12 = scmp.ne.s32.totalorder %s324_s30, %s551_s6  ;;  %p557_p0 = scmp.lt.s32.totalorder %s551_s6, %s551_s6 }
  0x61   :  { %v87_v15 = vld [vmem:[#allocation2 + $0x8] sm:$0xff]  ;;  %v438_v16 = vld [vmem:[#allocation8 + $0x28] sm:$0xff]   ;;  %v337_v20 = vld [vmem:[#allocation7] ss:$0 sm:$0xff] }
  0x62   :  { %v88_v17 = vpack.c.bf16 %v87_v15, %v86_v14  ;;  %v439_v18 = vld [vmem:[#allocation8 + $0x30] sm:$0xff]   ;;  %v440_v19 = vld [vmem:[#allocation8 + $0x38] sm:$0xff]   ;;  %v346_v30 = vld [vmem:[#allocation10] ss:$0 sm:$0xff]  ;;  %p558_p1 = por %p557_p0, %p556_p13 }
  0x63   :  { %376 = vmatpush3.bf16.msra.mxu0 %v426_v2  ;;  %396 = vmatpush3.bf16.msra.mxu1 %v434_v6 }
  0x64   :  { %377 = vmatprep.subr.bf16.mxu0 %v590_v0  ;;  %397 = vmatprep.subr.bf16.mxu1 %v590_v0  ;;  %p559_p2 = pnand %p558_p1, %p552_p12 }
  0x67   :  { %378 = vmatpush3.bf16.msra.mxu0 %v427_v3  ;;  %398 = vmatpush3.bf16.msra.mxu1 %v435_v8 }
  0x68   :  { %379 = vmatprep.subr.bf16.mxu0 %v590_v0  ;;  %399 = vmatprep.subr.bf16.mxu1 %v590_v0 }
  0x6b   :  { %380 = vmatpush3.bf16.msra.mxu0 %v428_v5  ;;  %400 = vmatpush3.bf16.msra.mxu1 %v436_v10 }
  0x6c   :  { %381 = vmatprep.subr.bf16.mxu0 %v590_v0  ;;  %401 = vmatprep.subr.bf16.mxu1 %v590_v0 }
  0x6f   :  { %382 = vmatpush3.bf16.msra.mxu0 %v429_v7  ;;  %402 = vmatpush3.bf16.msra.mxu1 %v437_v12 }
  0x70   :  { %383 = vmatprep.subr.bf16.mxu0 %v590_v0  ;;  %403 = vmatprep.subr.bf16.mxu1 %v590_v0 }
  0x73   :  { %384 = vmatpush3.bf16.msra.mxu0 %v430_v9  ;;  %404 = vmatpush3.bf16.msra.mxu1 %v438_v16 }
  0x74   :  { %385 = vmatprep.subr.bf16.mxu0 %v590_v0  ;;  %405 = vmatprep.subr.bf16.mxu1 %v590_v0 }
  0x77   :  { %386 = vmatpush3.bf16.msra.mxu0 %v431_v11  ;;  %406 = vmatpush3.bf16.msra.mxu1 %v439_v18 }
  0x78   :  { %387 = vmatprep.subr.bf16.mxu0 %v590_v0  ;;  %407 = vmatprep.subr.bf16.mxu1 %v590_v0 }
  0x7b   :  { %388 = vmatpush3.bf16.msra.mxu0 %v432_v13  ;;  %408 = vmatpush3.bf16.msra.mxu1 %v440_v19 }
  0x7e   :  { %390 = vmatmul.mubr.bf16.vlgmr.msra.gmra.mrb[0].mxu0 %v88_v17 }
 0x151   :  { %v194_v21 = vpop.f32.mrb[0].mxu0 }
 0x152   :  { %v195_v22 = vadd.f32 %v337_v20, %v194_v21  ;;  %v391_v23 = vpop.f32.mrb[1].mxu0 }
 0x153   :  { %v197_v24 = vpop.f32.mrb[2].mxu0 }
 0x154   :  { %v198_v25 = vadd.f32 %v337_v20, %v197_v24  ;;  %v392_v26 = vpop.f32.mrb[3].mxu0  ;;  %v201_v27 = vmax.f32 %v195_v22, 0.0 }
 0x156   :  { %v202_v28 = vmax.f32 %v198_v25, 0.0 }
 0x158   :  { %v203_v29 = vpack.c.bf16 %v202_v28, %v201_v27 }
 0x15a   :  { %410 = vmatmul.mubr.bf16.vlgmr.msra.gmra.mrb[0].mxu1 %v203_v29 }
 0x22d   :  { %v309_v31 = vpop.f32.mrb[0].mxu1 }
 0x22e   :  { %v310_v32 = vadd.f32 %v346_v30, %v309_v31  ;;  %v411_v33 = vpop.f32.mrb[1].mxu1 }
 0x22f   :  { %v312_v34 = vpop.f32.mrb[2].mxu1 }
 0x230   :  { %316 = vst [vmem:[#allocation11] sm:$0xff] %v310_v32  ;;  %v313_v35 = vadd.f32 %v346_v30, %v312_v34  ;;  %v412_v36 = vpop.f32.mrb[3].mxu1 }
 0x232   :  { %317 = vst [vmem:[#allocation11 + $0x8] sm:$0xff] %v313_v35 }
 0x233   :  { %562 = shalt.err (!%p559_p2)
}
 0x234   :  { %s563_s9 = scalar_lea.hbm %s706_s5, 256 }
 0x235   :  { %p564_p3 = scmp.ne.s32.totalorder %s706_s5, %s563_s9  ;;  %p567_p4 = scmp.lt.u32.totalorder %s563_s9, %s706_s5 }
 0x237   :  { %p569_p5 = pnand %p567_p4, %p564_p3 }
 0x239   :  { %572 = shalt.err (!%p569_p5)
}
 0x23a   :  { %329 = dma.vmem_to_hbm [thread:$0]  %s324_s30, 256, %s706_s5, [#allocation4], %s586_s3, %s586_s3, %s587_s28  }
 0x23b   :  { %579 = dma.done.wait [#allocation4], 256  }
 0x23c   :  { %580 = vsyncadd [#allocation4], 4294967040 }
 0x23d   :  { %333 = vsyncpa [#allocation3], 1 }
 0x23e   :  { %334 = vsyncpa [#allocation6], 1 }
 0x23f   :  { %335 = vsyncpa [#allocation9], 1 }
 0x240   :  { %336 = vsyncpa [#allocation4], 1 }

</bundles_post_ra>
